<compile_context>
chip_gen: v6e
topology: v6e:2x2x1
jax: 0.10.0
libtpu: 0.0.40
codegen_flags: <defaults>
</compile_context>

<pallas_src>
import math
from functools import partial

import jax
import jax.numpy as jnp
from jax.experimental import pallas as pl
from jax.experimental.pallas import tpu as pltpu


# ----------------------------- Pallas kernels ------------------------------

def _in_proj_kernel(x_ref, w_ref, b_ref, pe_ref, o_ref):
    """Fused input projection + positional-encoding add for one batch element."""
    x = x_ref[0]                                    # (S, Din)
    y = jnp.dot(x, w_ref[...], preferred_element_type=jnp.float32)
    o_ref[0] = (y + b_ref[...] + pe_ref[...]).astype(o_ref.dtype)


def _encoder_layer_kernel(h_ref, wqkv_ref, bqkv_ref, wo_ref, bo_ref,
                          g1_ref, be1_ref, w1_ref, bf1_ref, w2_ref, bf2_ref,
                          g2_ref, be2_ref, o_ref, *, nhead, eps):
    """One fused nn.TransformerEncoderLayer (post-norm, ReLU) per batch elem."""
    x = h_ref[0]                                    # (S, D) f32, VMEM-resident
    S, D = x.shape
    dh = D // nhead
    scale = 1.0 / math.sqrt(dh)

    # Fused QKV projection: one (S, D) x (D, 3D) MXU pass.
    qkv = (jnp.dot(x, wqkv_ref[...], preferred_element_type=jnp.float32)
           + bqkv_ref[...])                         # (S, 3D)
    wo = wo_ref[...]                                # (D, D)

    # Per-head attention with the output projection folded per head, so the
    # accumulated result is a lane-dense (S, D) slab (no concat / transpose).
    attn = jnp.zeros((S, D), jnp.float32)
    for h in range(nhead):
        qh = qkv[:, h * dh:(h + 1) * dh]                    # (S, dh)
        kh = qkv[:, D + h * dh:D + (h + 1) * dh]            # (S, dh)
        vh = qkv[:, 2 * D + h * dh:2 * D + (h + 1) * dh]    # (S, dh)
        s = jax.lax.dot_general(qh, kh, (((1,), (1,)), ((), ())),
                                preferred_element_type=jnp.float32) * scale
        s = s - jnp.max(s, axis=-1, keepdims=True)
        p = jnp.exp(s)
        p = p * pl.reciprocal(jnp.sum(p, axis=-1, keepdims=True), approx=True)
        oh = jnp.dot(p, vh, preferred_element_type=jnp.float32)        # (S, dh)
        attn = attn + jnp.dot(oh, wo[h * dh:(h + 1) * dh, :],
                              preferred_element_type=jnp.float32)      # (S, D)
    attn = attn + bo_ref[...]

    # Residual + LayerNorm 1 (post-norm, matches nn.LayerNorm eps/affine).
    z = x + attn
    mu = jnp.mean(z, axis=-1, keepdims=True)
    var = jnp.mean(jnp.square(z - mu), axis=-1, keepdims=True)
    y = (z - mu) * jax.lax.rsqrt(var + eps) * g1_ref[...] + be1_ref[...]

    # Feed-forward (ReLU) + residual + LayerNorm 2.
    ff = jnp.dot(y, w1_ref[...], preferred_element_type=jnp.float32) + bf1_ref[...]
    ff = jnp.maximum(ff, 0.0)
    ff = jnp.dot(ff, w2_ref[...], preferred_element_type=jnp.float32) + bf2_ref[...]
    z2 = y + ff
    mu2 = jnp.mean(z2, axis=-1, keepdims=True)
    var2 = jnp.mean(jnp.square(z2 - mu2), axis=-1, keepdims=True)
    o_ref[0] = ((z2 - mu2) * jax.lax.rsqrt(var2 + eps) * g2_ref[...]
                + be2_ref[...]).astype(o_ref.dtype)


def _pool_linear_kernel(x_ref, w_ref, b_ref, o_ref):
    """Mean over the sequence dim fused with the output linear layer."""
    m = jnp.mean(x_ref[...], axis=1)                # (B, D)
    o_ref[...] = (jnp.dot(m, w_ref[...], preferred_element_type=jnp.float32)
                  + b_ref[...]).astype(o_ref.dtype)


# ----------------------------- Kernel wrappers ------------------------------

def input_projection_pe(x, w, b, pe):
    """x:[B,S,Din] @ w:[Din,D] + b + pe:[S,D] -> [B,S,D]; grid over batch."""
    B, S, Din = x.shape
    D = w.shape[1]
    return pl.pallas_call(
        _in_proj_kernel,
        out_shape=jax.ShapeDtypeStruct((B, S, D), jnp.float32),
        grid=(B,),
        in_specs=[
            pl.BlockSpec((1, S, Din), lambda i: (i, 0, 0)),
            pl.BlockSpec((Din, D), lambda i: (0, 0)),
            pl.BlockSpec((1, D), lambda i: (0, 0)),
            pl.BlockSpec((S, D), lambda i: (0, 0)),
        ],
        out_specs=pl.BlockSpec((1, S, D), lambda i: (i, 0, 0)),
        compiler_params=pltpu.CompilerParams(dimension_semantics=("parallel",)),
    )(x, w, b.reshape(1, D), pe)


def encoder_layer(h, p, nhead, eps=1e-5):
    """One fused TransformerEncoderLayer. h:[B,S,D] -> [B,S,D]."""
    B, S, D = h.shape
    FF = p["w1"].shape[1]
    return pl.pallas_call(
        partial(_encoder_layer_kernel, nhead=nhead, eps=eps),
        out_shape=jax.ShapeDtypeStruct((B, S, D), jnp.float32),
        grid=(B,),
        in_specs=[
            pl.BlockSpec((1, S, D), lambda i: (i, 0, 0)),    # h
            pl.BlockSpec((D, 3 * D), lambda i: (0, 0)),      # wqkv (fused)
            pl.BlockSpec((1, 3 * D), lambda i: (0, 0)),      # bqkv
            pl.BlockSpec((D, D), lambda i: (0, 0)),          # wo
            pl.BlockSpec((1, D), lambda i: (0, 0)),          # bo
            pl.BlockSpec((1, D), lambda i: (0, 0)),          # ln1 gamma
            pl.BlockSpec((1, D), lambda i: (0, 0)),          # ln1 beta
            pl.BlockSpec((D, FF), lambda i: (0, 0)),         # w1
            pl.BlockSpec((1, FF), lambda i: (0, 0)),         # b1
            pl.BlockSpec((FF, D), lambda i: (0, 0)),         # w2
            pl.BlockSpec((1, D), lambda i: (0, 0)),          # b2
            pl.BlockSpec((1, D), lambda i: (0, 0)),          # ln2 gamma
            pl.BlockSpec((1, D), lambda i: (0, 0)),          # ln2 beta
        ],
        out_specs=pl.BlockSpec((1, S, D), lambda i: (i, 0, 0)),
        compiler_params=pltpu.CompilerParams(dimension_semantics=("parallel",)),
    )(h,
      p["wqkv"], p["bqkv"].reshape(1, 3 * D),
      p["wo"], p["bo"].reshape(1, D),
      p["ln1_g"].reshape(1, D), p["ln1_b"].reshape(1, D),
      p["w1"], p["b1"].reshape(1, FF),
      p["w2"], p["b2"].reshape(1, D),
      p["ln2_g"].reshape(1, D), p["ln2_b"].reshape(1, D))


def mean_pool_linear(x, w, b):
    """x:[B,S,D] -> mean over S -> @ w:[D,C] + b -> [B,C]."""
    B, S, D = x.shape
    C = w.shape[1]
    return pl.pallas_call(
        _pool_linear_kernel,
        out_shape=jax.ShapeDtypeStruct((B, C), jnp.float32),
    )(x, w, b.reshape(1, C))


# ----------------------------- Model assembly ------------------------------

def make_positional_encoding(max_seq_length, d_model):
    position = jnp.arange(max_seq_length, dtype=jnp.float32)[:, None]
    div_term = jnp.exp(jnp.arange(0, d_model, 2, dtype=jnp.float32)
                       * (-math.log(10000.0) / d_model))
    pe = jnp.zeros((max_seq_length, d_model), dtype=jnp.float32)
    pe = pe.at[:, 0::2].set(jnp.sin(position * div_term))
    pe = pe.at[:, 1::2].set(jnp.cos(position * div_term))
    return pe  # (max_seq_length, d_model)


def init_params(key, input_dim, d_model, nhead, num_layers, dim_feedforward,
                num_classes, max_seq_length):
    def dense(k, fan_in, fan_out):
        kw, kb = jax.random.split(k)
        scale = 1.0 / math.sqrt(fan_in)
        w = jax.random.uniform(kw, (fan_in, fan_out), jnp.float32, -scale, scale)
        b = jax.random.uniform(kb, (fan_out,), jnp.float32, -scale, scale)
        return w, b

    keys = jax.random.split(key, 2 + num_layers)
    params = {}
    params["in_proj_w"], params["in_proj_b"] = dense(keys[0], input_dim, d_model)
    params["out_w"], params["out_b"] = dense(keys[1], d_model, num_classes)
    params["pe"] = make_positional_encoding(max_seq_length, d_model)

    layers = []
    for li in range(num_layers):
        lk = jax.random.split(keys[2 + li], 6)
        p = {}
        wq, bq = dense(lk[0], d_model, d_model)
        wk, bk = dense(lk[1], d_model, d_model)
        wv, bv = dense(lk[2], d_model, d_model)
        p["wqkv"] = jnp.concatenate([wq, wk, wv], axis=1)     # fused QKV (D, 3D)
        p["bqkv"] = jnp.concatenate([bq, bk, bv], axis=0)     # (3D,)
        p["wo"], p["bo"] = dense(lk[3], d_model, d_model)
        p["w1"], p["b1"] = dense(lk[4], d_model, dim_feedforward)
        p["w2"], p["b2"] = dense(lk[5], dim_feedforward, d_model)
        p["ln1_g"] = jnp.ones((d_model,), jnp.float32)
        p["ln1_b"] = jnp.zeros((d_model,), jnp.float32)
        p["ln2_g"] = jnp.ones((d_model,), jnp.float32)
        p["ln2_b"] = jnp.zeros((d_model,), jnp.float32)
        layers.append(p)
    params["layers"] = layers
    return params


def transformer_forward(x, params, nhead):
    """x: [B, S, input_dim] -> logits [B, num_classes]."""
    B, S, _ = x.shape
    pe = params["pe"][:S]                                     # (S, D)
    # TODO(synk): dropout after PE / inside encoder layers is identity
    # (inference mode); only the src_key_padding_mask=None path is implemented.
    h = input_projection_pe(x, params["in_proj_w"], params["in_proj_b"], pe)
    for p in params["layers"]:
        h = encoder_layer(h, p, nhead)
    return mean_pool_linear(h, params["out_w"], params["out_b"])


# ------------------------------------ main ---------------------------------

if __name__ == "__main__":
    # small shapes consistent with the module's forward
    B, S = 2, 8
    INPUT_DIM = 32
    D_MODEL = 32
    NHEAD = 4
    NUM_LAYERS = 2
    DIM_FF = 64
    NUM_CLASSES = 16
    MAX_SEQ = 16

    key = jax.random.PRNGKey(0)
    kx, kp = jax.random.split(key)

    x = jax.random.normal(kx, (B, S, INPUT_DIM), dtype=jnp.float32)
    params = init_params(kp, INPUT_DIM, D_MODEL, NHEAD, NUM_LAYERS, DIM_FF,
                         NUM_CLASSES, MAX_SEQ)

    fwd = jax.jit(partial(transformer_forward, nhead=NHEAD))
    out = fwd(x, params)
    out = jax.block_until_ready(out)

    assert out.shape == (B, NUM_CLASSES), out.shape
    assert jnp.all(jnp.isfinite(out))
    print("KERNEL_OK")
</pallas_src>

<mosaic_0001>
module attributes {stable_mosaic.version = 11 : i64} {
  func.func @_encoder_layer_kernel(%arg0: i32, %arg1: memref<1x8x32xf32, #tpu.memory_space<vmem>>, %arg2: memref<32x96xf32, #tpu.memory_space<vmem>>, %arg3: memref<1x96xf32, #tpu.memory_space<vmem>>, %arg4: memref<32x32xf32, #tpu.memory_space<vmem>>, %arg5: memref<1x32xf32, #tpu.memory_space<vmem>>, %arg6: memref<1x32xf32, #tpu.memory_space<vmem>>, %arg7: memref<1x32xf32, #tpu.memory_space<vmem>>, %arg8: memref<32x64xf32, #tpu.memory_space<vmem>>, %arg9: memref<1x64xf32, #tpu.memory_space<vmem>>, %arg10: memref<64x32xf32, #tpu.memory_space<vmem>>, %arg11: memref<1x32xf32, #tpu.memory_space<vmem>>, %arg12: memref<1x32xf32, #tpu.memory_space<vmem>>, %arg13: memref<1x32xf32, #tpu.memory_space<vmem>>, %arg14: memref<1x8x32xf32, #tpu.memory_space<vmem>>) attributes {dimension_semantics = [#tpu.dimension_semantics<parallel>], iteration_bounds = array<i64: 2>, scalar_prefetch = 0 : i64, scratch_operands = 0 : i64, tpu.core_type = #tpu.core_type<tc>, window_params = [{transform_indices = @transform_0, window_bounds = array<i64: 1, 8, 32>}, {pipeline_mode = #tpu.pipeline_mode<synchronous>, transform_indices = @transform_1, window_bounds = array<i64: 32, 96>}, {pipeline_mode = #tpu.pipeline_mode<synchronous>, transform_indices = @transform_2, window_bounds = array<i64: 1, 96>}, {pipeline_mode = #tpu.pipeline_mode<synchronous>, transform_indices = @transform_3, window_bounds = array<i64: 32, 32>}, {pipeline_mode = #tpu.pipeline_mode<synchronous>, transform_indices = @transform_4, window_bounds = array<i64: 1, 32>}, {pipeline_mode = #tpu.pipeline_mode<synchronous>, transform_indices = @transform_5, window_bounds = array<i64: 1, 32>}, {pipeline_mode = #tpu.pipeline_mode<synchronous>, transform_indices = @transform_6, window_bounds = array<i64: 1, 32>}, {pipeline_mode = #tpu.pipeline_mode<synchronous>, transform_indices = @transform_7, window_bounds = array<i64: 32, 64>}, {pipeline_mode = #tpu.pipeline_mode<synchronous>, transform_indices = @transform_8, window_bounds = array<i64: 1, 64>}, {pipeline_mode = #tpu.pipeline_mode<synchronous>, transform_indices = @transform_9, window_bounds = array<i64: 64, 32>}, {pipeline_mode = #tpu.pipeline_mode<synchronous>, transform_indices = @transform_10, window_bounds = array<i64: 1, 32>}, {pipeline_mode = #tpu.pipeline_mode<synchronous>, transform_indices = @transform_11, window_bounds = array<i64: 1, 32>}, {pipeline_mode = #tpu.pipeline_mode<synchronous>, transform_indices = @transform_12, window_bounds = array<i64: 1, 32>}, {transform_indices = @transform_13, window_bounds = array<i64: 1, 8, 32>}]} {
    %c0 = arith.constant 0 : index
    %c0_0 = arith.constant 0 : index
    %c0_1 = arith.constant 0 : index
    %0 = vector.load %arg1[%c0, %c0_0, %c0_1] : memref<1x8x32xf32, #tpu.memory_space<vmem>>, vector<1x8x32xf32>
    %1 = vector.shape_cast %0 : vector<1x8x32xf32> to vector<8x32xf32>
    %c0_2 = arith.constant 0 : index
    %c0_3 = arith.constant 0 : index
    %2 = vector.load %arg2[%c0_2, %c0_3] : memref<32x96xf32, #tpu.memory_space<vmem>>, vector<32x96xf32>
    %cst = arith.constant dense<0.000000e+00> : vector<8x96xf32>
    %3 = tpu.matmul %1, %2, %cst {dimension_numbers = #tpu.dot_dimension_numbers<[1], [0], [0], [1], [0, 0, 1, 1], [], []>} : vector<8x32xf32>, vector<32x96xf32>, vector<8x96xf32> -> vector<8x96xf32>
    %c0_4 = arith.constant 0 : index
    %c0_5 = arith.constant 0 : index
    %4 = vector.load %arg3[%c0_4, %c0_5] : memref<1x96xf32, #tpu.memory_space<vmem>>, vector<1x96xf32>
    %5 = vector.broadcast %4 : vector<1x96xf32> to vector<8x96xf32>
    %6 = arith.addf %3, %5 : vector<8x96xf32>
    %c0_6 = arith.constant 0 : index
    %c0_7 = arith.constant 0 : index
    %7 = vector.load %arg4[%c0_6, %c0_7] : memref<32x32xf32, #tpu.memory_space<vmem>>, vector<32x32xf32>
    %cst_8 = arith.constant 0.000000e+00 : f32
    %8 = vector.broadcast %cst_8 : f32 to vector<8x32xf32>
    %9 = vector.extract_strided_slice %6 {offsets = [0, 0], sizes = [8, 8], strides = [1, 1]} : vector<8x96xf32> to vector<8x8xf32>
    %10 = vector.extract_strided_slice %6 {offsets = [0, 32], sizes = [8, 8], strides = [1, 1]} : vector<8x96xf32> to vector<8x8xf32>
    %11 = vector.extract_strided_slice %6 {offsets = [0, 64], sizes = [8, 8], strides = [1, 1]} : vector<8x96xf32> to vector<8x8xf32>
    %cst_9 = arith.constant dense<0.000000e+00> : vector<8x8xf32>
    %12 = tpu.matmul %9, %10, %cst_9 {dimension_numbers = #tpu.dot_dimension_numbers<[1], [1], [0], [0], [0, 0, 1, 0], [], []>} : vector<8x8xf32>, vector<8x8xf32>, vector<8x8xf32> -> vector<8x8xf32>
    %cst_10 = arith.constant 0.353553385 : f32
    %13 = vector.broadcast %cst_10 : f32 to vector<8x8xf32>
    %14 = arith.mulf %12, %13 : vector<8x8xf32>
    %cst_11 = arith.constant dense<0xFF800000> : vector<8xf32>
    %15 = vector.multi_reduction <maximumf>, %14, %cst_11 [1] : vector<8x8xf32> to vector<8xf32>
    %16 = vector.shape_cast %15 : vector<8xf32> to vector<8x1xf32>
    %17 = vector.broadcast %16 : vector<8x1xf32> to vector<8x8xf32>
    %18 = arith.subf %14, %17 : vector<8x8xf32>
    %19 = math.exp %18 : vector<8x8xf32>
    %cst_12 = arith.constant dense<0.000000e+00> : vector<8xf32>
    %20 = vector.multi_reduction <add>, %19, %cst_12 [1] : vector<8x8xf32> to vector<8xf32>
    %21 = vector.shape_cast %20 : vector<8xf32> to vector<8x1xf32>
    %22 = tpu.reciprocal %21 {approx = true} : vector<8x1xf32> -> vector<8x1xf32>
    %23 = vector.broadcast %22 : vector<8x1xf32> to vector<8x8xf32>
    %24 = arith.mulf %19, %23 : vector<8x8xf32>
    %cst_13 = arith.constant dense<0.000000e+00> : vector<8x8xf32>
    %25 = tpu.matmul %24, %11, %cst_13 {dimension_numbers = #tpu.dot_dimension_numbers<[1], [0], [0], [1], [0, 0, 1, 1], [], []>} : vector<8x8xf32>, vector<8x8xf32>, vector<8x8xf32> -> vector<8x8xf32>
    %26 = vector.extract_strided_slice %7 {offsets = [0, 0], sizes = [8, 32], strides = [1, 1]} : vector<32x32xf32> to vector<8x32xf32>
    %cst_14 = arith.constant dense<0.000000e+00> : vector<8x32xf32>
    %27 = tpu.matmul %25, %26, %cst_14 {dimension_numbers = #tpu.dot_dimension_numbers<[1], [0], [0], [1], [0, 0, 1, 1], [], []>} : vector<8x8xf32>, vector<8x32xf32>, vector<8x32xf32> -> vector<8x32xf32>
    %28 = arith.addf %8, %27 : vector<8x32xf32>
    %29 = vector.extract_strided_slice %6 {offsets = [0, 8], sizes = [8, 8], strides = [1, 1]} : vector<8x96xf32> to vector<8x8xf32>
    %30 = vector.extract_strided_slice %6 {offsets = [0, 40], sizes = [8, 8], strides = [1, 1]} : vector<8x96xf32> to vector<8x8xf32>
    %31 = vector.extract_strided_slice %6 {offsets = [0, 72], sizes = [8, 8], strides = [1, 1]} : vector<8x96xf32> to vector<8x8xf32>
    %cst_15 = arith.constant dense<0.000000e+00> : vector<8x8xf32>
    %32 = tpu.matmul %29, %30, %cst_15 {dimension_numbers = #tpu.dot_dimension_numbers<[1], [1], [0], [0], [0, 0, 1, 0], [], []>} : vector<8x8xf32>, vector<8x8xf32>, vector<8x8xf32> -> vector<8x8xf32>
    %cst_16 = arith.constant 0.353553385 : f32
    %33 = vector.broadcast %cst_16 : f32 to vector<8x8xf32>
    %34 = arith.mulf %32, %33 : vector<8x8xf32>
    %cst_17 = arith.constant dense<0xFF800000> : vector<8xf32>
    %35 = vector.multi_reduction <maximumf>, %34, %cst_17 [1] : vector<8x8xf32> to vector<8xf32>
    %36 = vector.shape_cast %35 : vector<8xf32> to vector<8x1xf32>
    %37 = vector.broadcast %36 : vector<8x1xf32> to vector<8x8xf32>
    %38 = arith.subf %34, %37 : vector<8x8xf32>
    %39 = math.exp %38 : vector<8x8xf32>
    %cst_18 = arith.constant dense<0.000000e+00> : vector<8xf32>
    %40 = vector.multi_reduction <add>, %39, %cst_18 [1] : vector<8x8xf32> to vector<8xf32>
    %41 = vector.shape_cast %40 : vector<8xf32> to vector<8x1xf32>
    %42 = tpu.reciprocal %41 {approx = true} : vector<8x1xf32> -> vector<8x1xf32>
    %43 = vector.broadcast %42 : vector<8x1xf32> to vector<8x8xf32>
    %44 = arith.mulf %39, %43 : vector<8x8xf32>
    %cst_19 = arith.constant dense<0.000000e+00> : vector<8x8xf32>
    %45 = tpu.matmul %44, %31, %cst_19 {dimension_numbers = #tpu.dot_dimension_numbers<[1], [0], [0], [1], [0, 0, 1, 1], [], []>} : vector<8x8xf32>, vector<8x8xf32>, vector<8x8xf32> -> vector<8x8xf32>
    %46 = vector.extract_strided_slice %7 {offsets = [8, 0], sizes = [8, 32], strides = [1, 1]} : vector<32x32xf32> to vector<8x32xf32>
    %cst_20 = arith.constant dense<0.000000e+00> : vector<8x32xf32>
    %47 = tpu.matmul %45, %46, %cst_20 {dimension_numbers = #tpu.dot_dimension_numbers<[1], [0], [0], [1], [0, 0, 1, 1], [], []>} : vector<8x8xf32>, vector<8x32xf32>, vector<8x32xf32> -> vector<8x32xf32>
    %48 = arith.addf %28, %47 : vector<8x32xf32>
    %49 = vector.extract_strided_slice %6 {offsets = [0, 16], sizes = [8, 8], strides = [1, 1]} : vector<8x96xf32> to vector<8x8xf32>
    %50 = vector.extract_strided_slice %6 {offsets = [0, 48], sizes = [8, 8], strides = [1, 1]} : vector<8x96xf32> to vector<8x8xf32>
    %51 = vector.extract_strided_slice %6 {offsets = [0, 80], sizes = [8, 8], strides = [1, 1]} : vector<8x96xf32> to vector<8x8xf32>
    %cst_21 = arith.constant dense<0.000000e+00> : vector<8x8xf32>
    %52 = tpu.matmul %49, %50, %cst_21 {dimension_numbers = #tpu.dot_dimension_numbers<[1], [1], [0], [0], [0, 0, 1, 0], [], []>} : vector<8x8xf32>, vector<8x8xf32>, vector<8x8xf32> -> vector<8x8xf32>
    %cst_22 = arith.constant 0.353553385 : f32
    %53 = vector.broadcast %cst_22 : f32 to vector<8x8xf32>
    %54 = arith.mulf %52, %53 : vector<8x8xf32>
    %cst_23 = arith.constant dense<0xFF800000> : vector<8xf32>
    %55 = vector.multi_reduction <maximumf>, %54, %cst_23 [1] : vector<8x8xf32> to vector<8xf32>
    %56 = vector.shape_cast %55 : vector<8xf32> to vector<8x1xf32>
    %57 = vector.broadcast %56 : vector<8x1xf32> to vector<8x8xf32>
    %58 = arith.subf %54, %57 : vector<8x8xf32>
    %59 = math.exp %58 : vector<8x8xf32>
    %cst_24 = arith.constant dense<0.000000e+00> : vector<8xf32>
    %60 = vector.multi_reduction <add>, %59, %cst_24 [1] : vector<8x8xf32> to vector<8xf32>
    %61 = vector.shape_cast %60 : vector<8xf32> to vector<8x1xf32>
    %62 = tpu.reciprocal %61 {approx = true} : vector<8x1xf32> -> vector<8x1xf32>
    %63 = vector.broadcast %62 : vector<8x1xf32> to vector<8x8xf32>
    %64 = arith.mulf %59, %63 : vector<8x8xf32>
    %cst_25 = arith.constant dense<0.000000e+00> : vector<8x8xf32>
    %65 = tpu.matmul %64, %51, %cst_25 {dimension_numbers = #tpu.dot_dimension_numbers<[1], [0], [0], [1], [0, 0, 1, 1], [], []>} : vector<8x8xf32>, vector<8x8xf32>, vector<8x8xf32> -> vector<8x8xf32>
    %66 = vector.extract_strided_slice %7 {offsets = [16, 0], sizes = [8, 32], strides = [1, 1]} : vector<32x32xf32> to vector<8x32xf32>
    %cst_26 = arith.constant dense<0.000000e+00> : vector<8x32xf32>
    %67 = tpu.matmul %65, %66, %cst_26 {dimension_numbers = #tpu.dot_dimension_numbers<[1], [0], [0], [1], [0, 0, 1, 1], [], []>} : vector<8x8xf32>, vector<8x32xf32>, vector<8x32xf32> -> vector<8x32xf32>
    %68 = arith.addf %48, %67 : vector<8x32xf32>
    %69 = vector.extract_strided_slice %6 {offsets = [0, 24], sizes = [8, 8], strides = [1, 1]} : vector<8x96xf32> to vector<8x8xf32>
    %70 = vector.extract_strided_slice %6 {offsets = [0, 56], sizes = [8, 8], strides = [1, 1]} : vector<8x96xf32> to vector<8x8xf32>
    %71 = vector.extract_strided_slice %6 {offsets = [0, 88], sizes = [8, 8], strides = [1, 1]} : vector<8x96xf32> to vector<8x8xf32>
    %cst_27 = arith.constant dense<0.000000e+00> : vector<8x8xf32>
    %72 = tpu.matmul %69, %70, %cst_27 {dimension_numbers = #tpu.dot_dimension_numbers<[1], [1], [0], [0], [0, 0, 1, 0], [], []>} : vector<8x8xf32>, vector<8x8xf32>, vector<8x8xf32> -> vector<8x8xf32>
    %cst_28 = arith.constant 0.353553385 : f32
    %73 = vector.broadcast %cst_28 : f32 to vector<8x8xf32>
    %74 = arith.mulf %72, %73 : vector<8x8xf32>
    %cst_29 = arith.constant dense<0xFF800000> : vector<8xf32>
    %75 = vector.multi_reduction <maximumf>, %74, %cst_29 [1] : vector<8x8xf32> to vector<8xf32>
    %76 = vector.shape_cast %75 : vector<8xf32> to vector<8x1xf32>
    %77 = vector.broadcast %76 : vector<8x1xf32> to vector<8x8xf32>
    %78 = arith.subf %74, %77 : vector<8x8xf32>
    %79 = math.exp %78 : vector<8x8xf32>
    %cst_30 = arith.constant dense<0.000000e+00> : vector<8xf32>
    %80 = vector.multi_reduction <add>, %79, %cst_30 [1] : vector<8x8xf32> to vector<8xf32>
    %81 = vector.shape_cast %80 : vector<8xf32> to vector<8x1xf32>
    %82 = tpu.reciprocal %81 {approx = true} : vector<8x1xf32> -> vector<8x1xf32>
    %83 = vector.broadcast %82 : vector<8x1xf32> to vector<8x8xf32>
    %84 = arith.mulf %79, %83 : vector<8x8xf32>
    %cst_31 = arith.constant dense<0.000000e+00> : vector<8x8xf32>
    %85 = tpu.matmul %84, %71, %cst_31 {dimension_numbers = #tpu.dot_dimension_numbers<[1], [0], [0], [1], [0, 0, 1, 1], [], []>} : vector<8x8xf32>, vector<8x8xf32>, vector<8x8xf32> -> vector<8x8xf32>
    %86 = vector.extract_strided_slice %7 {offsets = [24, 0], sizes = [8, 32], strides = [1, 1]} : vector<32x32xf32> to vector<8x32xf32>
    %cst_32 = arith.constant dense<0.000000e+00> : vector<8x32xf32>
    %87 = tpu.matmul %85, %86, %cst_32 {dimension_numbers = #tpu.dot_dimension_numbers<[1], [0], [0], [1], [0, 0, 1, 1], [], []>} : vector<8x8xf32>, vector<8x32xf32>, vector<8x32xf32> -> vector<8x32xf32>
    %88 = arith.addf %68, %87 : vector<8x32xf32>
    %c0_33 = arith.constant 0 : index
    %c0_34 = arith.constant 0 : index
    %89 = vector.load %arg5[%c0_33, %c0_34] : memref<1x32xf32, #tpu.memory_space<vmem>>, vector<1x32xf32>
    %90 = vector.broadcast %89 : vector<1x32xf32> to vector<8x32xf32>
    %91 = arith.addf %88, %90 : vector<8x32xf32>
    %92 = arith.addf %1, %91 : vector<8x32xf32>
    %cst_35 = arith.constant dense<0.000000e+00> : vector<8xf32>
    %93 = vector.multi_reduction <add>, %92, %cst_35 [1] : vector<8x32xf32> to vector<8xf32>
    %94 = vector.shape_cast %93 : vector<8xf32> to vector<8x1xf32>
    %cst_36 = arith.constant 3.200000e+01 : f32
    %95 = vector.broadcast %cst_36 : f32 to vector<8x1xf32>
    %96 = arith.divf %94, %95 : vector<8x1xf32>
    %97 = vector.broadcast %96 : vector<8x1xf32> to vector<8x32xf32>
    %98 = arith.subf %92, %97 : vector<8x32xf32>
    %99 = arith.mulf %98, %98 : vector<8x32xf32>
    %cst_37 = arith.constant dense<0.000000e+00> : vector<8xf32>
    %100 = vector.multi_reduction <add>, %99, %cst_37 [1] : vector<8x32xf32> to vector<8xf32>
    %101 = vector.shape_cast %100 : vector<8xf32> to vector<8x1xf32>
    %cst_38 = arith.constant 3.200000e+01 : f32
    %102 = vector.broadcast %cst_38 : f32 to vector<8x1xf32>
    %103 = arith.divf %101, %102 : vector<8x1xf32>
    %104 = vector.broadcast %96 : vector<8x1xf32> to vector<8x32xf32>
    %105 = arith.subf %92, %104 : vector<8x32xf32>
    %cst_39 = arith.constant 9.99999974E-6 : f32
    %106 = vector.broadcast %cst_39 : f32 to vector<8x1xf32>
    %107 = arith.addf %103, %106 : vector<8x1xf32>
    %108 = math.rsqrt %107 : vector<8x1xf32>
    %109 = vector.broadcast %108 : vector<8x1xf32> to vector<8x32xf32>
    %110 = arith.mulf %105, %109 : vector<8x32xf32>
    %c0_40 = arith.constant 0 : index
    %c0_41 = arith.constant 0 : index
    %111 = vector.load %arg6[%c0_40, %c0_41] : memref<1x32xf32, #tpu.memory_space<vmem>>, vector<1x32xf32>
    %112 = vector.broadcast %111 : vector<1x32xf32> to vector<8x32xf32>
    %113 = arith.mulf %110, %112 : vector<8x32xf32>
    %c0_42 = arith.constant 0 : index
    %c0_43 = arith.constant 0 : index
    %114 = vector.load %arg7[%c0_42, %c0_43] : memref<1x32xf32, #tpu.memory_space<vmem>>, vector<1x32xf32>
    %115 = vector.broadcast %114 : vector<1x32xf32> to vector<8x32xf32>
    %116 = arith.addf %113, %115 : vector<8x32xf32>
    %c0_44 = arith.constant 0 : index
    %c0_45 = arith.constant 0 : index
    %117 = vector.load %arg8[%c0_44, %c0_45] : memref<32x64xf32, #tpu.memory_space<vmem>>, vector<32x64xf32>
    %cst_46 = arith.constant dense<0.000000e+00> : vector<8x64xf32>
    %118 = tpu.matmul %116, %117, %cst_46 {dimension_numbers = #tpu.dot_dimension_numbers<[1], [0], [0], [1], [0, 0, 1, 1], [], []>} : vector<8x32xf32>, vector<32x64xf32>, vector<8x64xf32> -> vector<8x64xf32>
    %c0_47 = arith.constant 0 : index
    %c0_48 = arith.constant 0 : index
    %119 = vector.load %arg9[%c0_47, %c0_48] : memref<1x64xf32, #tpu.memory_space<vmem>>, vector<1x64xf32>
    %120 = vector.broadcast %119 : vector<1x64xf32> to vector<8x64xf32>
    %121 = arith.addf %118, %120 : vector<8x64xf32>
    %cst_49 = arith.constant 0.000000e+00 : f32
    %122 = vector.broadcast %cst_49 : f32 to vector<8x64xf32>
    %123 = arith.maximumf %121, %122 : vector<8x64xf32>
    %c0_50 = arith.constant 0 : index
    %c0_51 = arith.constant 0 : index
    %124 = vector.load %arg10[%c0_50, %c0_51] : memref<64x32xf32, #tpu.memory_space<vmem>>, vector<64x32xf32>
    %cst_52 = arith.constant dense<0.000000e+00> : vector<8x32xf32>
    %125 = tpu.matmul %123, %124, %cst_52 {dimension_numbers = #tpu.dot_dimension_numbers<[1], [0], [0], [1], [0, 0, 1, 1], [], []>} : vector<8x64xf32>, vector<64x32xf32>, vector<8x32xf32> -> vector<8x32xf32>
    %c0_53 = arith.constant 0 : index
    %c0_54 = arith.constant 0 : index
    %126 = vector.load %arg11[%c0_53, %c0_54] : memref<1x32xf32, #tpu.memory_space<vmem>>, vector<1x32xf32>
    %127 = vector.broadcast %126 : vector<1x32xf32> to vector<8x32xf32>
    %128 = arith.addf %125, %127 : vector<8x32xf32>
    %129 = arith.addf %116, %128 : vector<8x32xf32>
    %cst_55 = arith.constant dense<0.000000e+00> : vector<8xf32>
    %130 = vector.multi_reduction <add>, %129, %cst_55 [1] : vector<8x32xf32> to vector<8xf32>
    %131 = vector.shape_cast %130 : vector<8xf32> to vector<8x1xf32>
    %cst_56 = arith.constant 3.200000e+01 : f32
    %132 = vector.broadcast %cst_56 : f32 to vector<8x1xf32>
    %133 = arith.divf %131, %132 : vector<8x1xf32>
    %134 = vector.broadcast %133 : vector<8x1xf32> to vector<8x32xf32>
    %135 = arith.subf %129, %134 : vector<8x32xf32>
    %136 = arith.mulf %135, %135 : vector<8x32xf32>
    %cst_57 = arith.constant dense<0.000000e+00> : vector<8xf32>
    %137 = vector.multi_reduction <add>, %136, %cst_57 [1] : vector<8x32xf32> to vector<8xf32>
    %138 = vector.shape_cast %137 : vector<8xf32> to vector<8x1xf32>
    %cst_58 = arith.constant 3.200000e+01 : f32
    %139 = vector.broadcast %cst_58 : f32 to vector<8x1xf32>
    %140 = arith.divf %138, %139 : vector<8x1xf32>
    %141 = vector.broadcast %133 : vector<8x1xf32> to vector<8x32xf32>
    %142 = arith.subf %129, %141 : vector<8x32xf32>
    %cst_59 = arith.constant 9.99999974E-6 : f32
    %143 = vector.broadcast %cst_59 : f32 to vector<8x1xf32>
    %144 = arith.addf %140, %143 : vector<8x1xf32>
    %145 = math.rsqrt %144 : vector<8x1xf32>
    %146 = vector.broadcast %145 : vector<8x1xf32> to vector<8x32xf32>
    %147 = arith.mulf %142, %146 : vector<8x32xf32>
    %c0_60 = arith.constant 0 : index
    %c0_61 = arith.constant 0 : index
    %148 = vector.load %arg12[%c0_60, %c0_61] : memref<1x32xf32, #tpu.memory_space<vmem>>, vector<1x32xf32>
    %149 = vector.broadcast %148 : vector<1x32xf32> to vector<8x32xf32>
    %150 = arith.mulf %147, %149 : vector<8x32xf32>
    %c0_62 = arith.constant 0 : index
    %c0_63 = arith.constant 0 : index
    %151 = vector.load %arg13[%c0_62, %c0_63] : memref<1x32xf32, #tpu.memory_space<vmem>>, vector<1x32xf32>
    %152 = vector.broadcast %151 : vector<1x32xf32> to vector<8x32xf32>
    %153 = arith.addf %150, %152 : vector<8x32xf32>
    %c0_64 = arith.constant 0 : index
    %c0_65 = arith.constant 0 : index
    %c0_66 = arith.constant 0 : index
    %154 = vector.load %arg14[%c0_64, %c0_65, %c0_66] : memref<1x8x32xf32, #tpu.memory_space<vmem>>, vector<1x8x32xf32>
    %155 = vector.shape_cast %154 : vector<1x8x32xf32> to vector<8x32xf32>
    %156 = vector.shape_cast %153 : vector<8x32xf32> to vector<1x8x32xf32>
    tpu.vector_store %arg14[%c0_64, %c0_65, %c0_66], %156 {strides = array<i32>} : memref<1x8x32xf32, #tpu.memory_space<vmem>>, vector<1x8x32xf32>,
    return
  }
  func.func @transform_0(%arg0: i32) -> (i32, i32, i32) {
    %c0_i32 = arith.constant 0 : i32
    %c0_i32_0 = arith.constant 0 : i32
    %c0_i32_1 = arith.constant 0 : i32
    return %arg0, %c0_i32, %c0_i32_0 : i32, i32, i32
  }
  func.func @transform_1(%arg0: i32) -> (i32, i32) {
    %c0_i32 = arith.constant 0 : i32
    %c0_i32_0 = arith.constant 0 : i32
    %c0_i32_1 = arith.constant 0 : i32
    return %c0_i32, %c0_i32_0 : i32, i32
  }
  func.func @transform_2(%arg0: i32) -> (i32, i32) {
    %c0_i32 = arith.constant 0 : i32
    %c0_i32_0 = arith.constant 0 : i32
    %c0_i32_1 = arith.constant 0 : i32
    return %c0_i32, %c0_i32_0 : i32, i32
  }
  func.func @transform_3(%arg0: i32) -> (i32, i32) {
    %c0_i32 = arith.constant 0 : i32
    %c0_i32_0 = arith.constant 0 : i32
    %c0_i32_1 = arith.constant 0 : i32
    return %c0_i32, %c0_i32_0 : i32, i32
  }
  func.func @transform_4(%arg0: i32) -> (i32, i32) {
    %c0_i32 = arith.constant 0 : i32
    %c0_i32_0 = arith.constant 0 : i32
    %c0_i32_1 = arith.constant 0 : i32
    return %c0_i32, %c0_i32_0 : i32, i32
  }
  func.func @transform_5(%arg0: i32) -> (i32, i32) {
    %c0_i32 = arith.constant 0 : i32
    %c0_i32_0 = arith.constant 0 : i32
    %c0_i32_1 = arith.constant 0 : i32
    return %c0_i32, %c0_i32_0 : i32, i32
  }
  func.func @transform_6(%arg0: i32) -> (i32, i32) {
    %c0_i32 = arith.constant 0 : i32
    %c0_i32_0 = arith.constant 0 : i32
    %c0_i32_1 = arith.constant 0 : i32
    return %c0_i32, %c0_i32_0 : i32, i32
  }
  func.func @transform_7(%arg0: i32) -> (i32, i32) {
    %c0_i32 = arith.constant 0 : i32
    %c0_i32_0 = arith.constant 0 : i32
    %c0_i32_1 = arith.constant 0 : i32
    return %c0_i32, %c0_i32_0 : i32, i32
  }
  func.func @transform_8(%arg0: i32) -> (i32, i32) {
    %c0_i32 = arith.constant 0 : i32
    %c0_i32_0 = arith.constant 0 : i32
    %c0_i32_1 = arith.constant 0 : i32
    return %c0_i32, %c0_i32_0 : i32, i32
  }
  func.func @transform_9(%arg0: i32) -> (i32, i32) {
    %c0_i32 = arith.constant 0 : i32
    %c0_i32_0 = arith.constant 0 : i32
    %c0_i32_1 = arith.constant 0 : i32
    return %c0_i32, %c0_i32_0 : i32, i32
  }
  func.func @transform_10(%arg0: i32) -> (i32, i32) {
    %c0_i32 = arith.constant 0 : i32
    %c0_i32_0 = arith.constant 0 : i32
    %c0_i32_1 = arith.constant 0 : i32
    return %c0_i32, %c0_i32_0 : i32, i32
  }
  func.func @transform_11(%arg0: i32) -> (i32, i32) {
    %c0_i32 = arith.constant 0 : i32
    %c0_i32_0 = arith.constant 0 : i32
    %c0_i32_1 = arith.constant 0 : i32
    return %c0_i32, %c0_i32_0 : i32, i32
  }
  func.func @transform_12(%arg0: i32) -> (i32, i32) {
    %c0_i32 = arith.constant 0 : i32
    %c0_i32_0 = arith.constant 0 : i32
    %c0_i32_1 = arith.constant 0 : i32
    return %c0_i32, %c0_i32_0 : i32, i32
  }
  func.func @transform_13(%arg0: i32) -> (i32, i32, i32) {
    %c0_i32 = arith.constant 0 : i32
    %c0_i32_0 = arith.constant 0 : i32
    %c0_i32_1 = arith.constant 0 : i32
    return %arg0, %c0_i32, %c0_i32_0 : i32, i32, i32
  }
}

module attributes {stable_mosaic.version = 11 : i64} {
  func.func @_in_proj_kernel(%arg0: i32, %arg1: memref<1x8x32xf32, #tpu.memory_space<vmem>>, %arg2: memref<32x32xf32, #tpu.memory_space<vmem>>, %arg3: memref<1x32xf32, #tpu.memory_space<vmem>>, %arg4: memref<8x32xf32, #tpu.memory_space<vmem>>, %arg5: memref<1x8x32xf32, #tpu.memory_space<vmem>>) attributes {dimension_semantics = [#tpu.dimension_semantics<parallel>], iteration_bounds = array<i64: 2>, scalar_prefetch = 0 : i64, scratch_operands = 0 : i64, tpu.core_type = #tpu.core_type<tc>, window_params = [{transform_indices = @transform_0, window_bounds = array<i64: 1, 8, 32>}, {pipeline_mode = #tpu.pipeline_mode<synchronous>, transform_indices = @transform_1, window_bounds = array<i64: 32, 32>}, {pipeline_mode = #tpu.pipeline_mode<synchronous>, transform_indices = @transform_2, window_bounds = array<i64: 1, 32>}, {pipeline_mode = #tpu.pipeline_mode<synchronous>, transform_indices = @transform_3, window_bounds = array<i64: 8, 32>}, {transform_indices = @transform_4, window_bounds = array<i64: 1, 8, 32>}]} {
    %c0 = arith.constant 0 : index
    %c0_0 = arith.constant 0 : index
    %c0_1 = arith.constant 0 : index
    %0 = vector.load %arg1[%c0, %c0_0, %c0_1] : memref<1x8x32xf32, #tpu.memory_space<vmem>>, vector<1x8x32xf32>
    %1 = vector.shape_cast %0 : vector<1x8x32xf32> to vector<8x32xf32>
    %c0_2 = arith.constant 0 : index
    %c0_3 = arith.constant 0 : index
    %2 = vector.load %arg2[%c0_2, %c0_3] : memref<32x32xf32, #tpu.memory_space<vmem>>, vector<32x32xf32>
    %cst = arith.constant dense<0.000000e+00> : vector<8x32xf32>
    %3 = tpu.matmul %1, %2, %cst {dimension_numbers = #tpu.dot_dimension_numbers<[1], [0], [0], [1], [0, 0, 1, 1], [], []>} : vector<8x32xf32>, vector<32x32xf32>, vector<8x32xf32> -> vector<8x32xf32>
    %c0_4 = arith.constant 0 : index
    %c0_5 = arith.constant 0 : index
    %4 = vector.load %arg3[%c0_4, %c0_5] : memref<1x32xf32, #tpu.memory_space<vmem>>, vector<1x32xf32>
    %5 = vector.broadcast %4 : vector<1x32xf32> to vector<8x32xf32>
    %6 = arith.addf %3, %5 : vector<8x32xf32>
    %c0_6 = arith.constant 0 : index
    %c0_7 = arith.constant 0 : index
    %7 = vector.load %arg4[%c0_6, %c0_7] : memref<8x32xf32, #tpu.memory_space<vmem>>, vector<8x32xf32>
    %8 = arith.addf %6, %7 : vector<8x32xf32>
    %c0_8 = arith.constant 0 : index
    %c0_9 = arith.constant 0 : index
    %c0_10 = arith.constant 0 : index
    %9 = vector.load %arg5[%c0_8, %c0_9, %c0_10] : memref<1x8x32xf32, #tpu.memory_space<vmem>>, vector<1x8x32xf32>
    %10 = vector.shape_cast %9 : vector<1x8x32xf32> to vector<8x32xf32>
    %11 = vector.shape_cast %8 : vector<8x32xf32> to vector<1x8x32xf32>
    tpu.vector_store %arg5[%c0_8, %c0_9, %c0_10], %11 {strides = array<i32>} : memref<1x8x32xf32, #tpu.memory_space<vmem>>, vector<1x8x32xf32>,
    return
  }
  func.func @transform_0(%arg0: i32) -> (i32, i32, i32) {
    %c0_i32 = arith.constant 0 : i32
    %c0_i32_0 = arith.constant 0 : i32
    %c0_i32_1 = arith.constant 0 : i32
    return %arg0, %c0_i32, %c0_i32_0 : i32, i32, i32
  }
  func.func @transform_1(%arg0: i32) -> (i32, i32) {
    %c0_i32 = arith.constant 0 : i32
    %c0_i32_0 = arith.constant 0 : i32
    %c0_i32_1 = arith.constant 0 : i32
    return %c0_i32, %c0_i32_0 : i32, i32
  }
  func.func @transform_2(%arg0: i32) -> (i32, i32) {
    %c0_i32 = arith.constant 0 : i32
    %c0_i32_0 = arith.constant 0 : i32
    %c0_i32_1 = arith.constant 0 : i32
    return %c0_i32, %c0_i32_0 : i32, i32
  }
  func.func @transform_3(%arg0: i32) -> (i32, i32) {
    %c0_i32 = arith.constant 0 : i32
    %c0_i32_0 = arith.constant 0 : i32
    %c0_i32_1 = arith.constant 0 : i32
    return %c0_i32, %c0_i32_0 : i32, i32
  }
  func.func @transform_4(%arg0: i32) -> (i32, i32, i32) {
    %c0_i32 = arith.constant 0 : i32
    %c0_i32_0 = arith.constant 0 : i32
    %c0_i32_1 = arith.constant 0 : i32
    return %arg0, %c0_i32, %c0_i32_0 : i32, i32, i32
  }
}

module attributes {stable_mosaic.version = 11 : i64} {
  func.func @_pool_linear_kernel(%arg0: memref<2x8x32xf32, #tpu.memory_space<vmem>>, %arg1: memref<32x16xf32, #tpu.memory_space<vmem>>, %arg2: memref<1x16xf32, #tpu.memory_space<vmem>>, %arg3: memref<2x16xf32, #tpu.memory_space<vmem>>) attributes {dimension_semantics = [], scalar_prefetch = 0 : i64, scratch_operands = 0 : i64, tpu.core_type = #tpu.core_type<tc>} {
    %c0 = arith.constant 0 : index
    %c0_0 = arith.constant 0 : index
    %c0_1 = arith.constant 0 : index
    %0 = vector.load %arg0[%c0, %c0_0, %c0_1] : memref<2x8x32xf32, #tpu.memory_space<vmem>>, vector<2x8x32xf32>
    %cst = arith.constant dense<0.000000e+00> : vector<2x32xf32>
    %1 = vector.multi_reduction <add>, %0, %cst [1] : vector<2x8x32xf32> to vector<2x32xf32>
    %cst_2 = arith.constant 8.000000e+00 : f32
    %2 = vector.broadcast %cst_2 : f32 to vector<2x32xf32>
    %3 = arith.divf %1, %2 : vector<2x32xf32>
    %c0_3 = arith.constant 0 : index
    %c0_4 = arith.constant 0 : index
    %4 = vector.load %arg1[%c0_3, %c0_4] : memref<32x16xf32, #tpu.memory_space<vmem>>, vector<32x16xf32>
    %cst_5 = arith.constant dense<0.000000e+00> : vector<2x16xf32>
    %5 = tpu.matmul %3, %4, %cst_5 {dimension_numbers = #tpu.dot_dimension_numbers<[1], [0], [0], [1], [0, 0, 1, 1], [], []>} : vector<2x32xf32>, vector<32x16xf32>, vector<2x16xf32> -> vector<2x16xf32>
    %c0_6 = arith.constant 0 : index
    %c0_7 = arith.constant 0 : index
    %6 = vector.load %arg2[%c0_6, %c0_7] : memref<1x16xf32, #tpu.memory_space<vmem>>, vector<1x16xf32>
    %7 = vector.broadcast %6 : vector<1x16xf32> to vector<2x16xf32>
    %8 = arith.addf %5, %7 : vector<2x16xf32>
    %c0_8 = arith.constant 0 : index
    %c0_9 = arith.constant 0 : index
    %9 = vector.load %arg3[%c0_8, %c0_9] : memref<2x16xf32, #tpu.memory_space<vmem>>, vector<2x16xf32>
    tpu.vector_store %arg3[%c0_8, %c0_9], %8 {strides = array<i32>} : memref<2x16xf32, #tpu.memory_space<vmem>>, vector<2x16xf32>,
    return
  }
}

</mosaic_0001>

<bundles_post_ra>
// kernel: transformer_forward.4
= control target key start
LH: loop header
LB: loop body
LE: loop exit
PB: predicated region body
PF: predicated region fallthrough
CT: control target
= control target key end

     0   :  { %s407_s15 = smov 0   ;;  %s442_s0 = inlined_call_operand.vmem [shape: f32[2,8,32], index: 0, kind: input, shape index: {}]   ;;  %s443_s1 = inlined_call_operand.vmem [shape: f32[32,32], index: 1, kind: input, shape index: {}]   ;;  %s444_s2 = inlined_call_operand.vmem [shape: f32[1,32], index: 2, kind: input, shape index: {}]   ;;  %s445_s3 = inlined_call_operand.vmem [shape: f32[8,32], index: 3, kind: input, shape index: {}]   ;;  %s446_s4 = inlined_call_operand.vmem [shape: f32[2,8,32], index: 4, kind: output, shape index: {}]  }
   0x1 LB: > { %s335_s16 = sadd.s32 4294967295, %s378_s15   ;;  %p339_p0 = scmp.ge.s32.totalorder %s378_s15, 1  ;;  %s378_s15 = sphi %s407_s15, %s14_s15  }
   0x2   : > { %p161_p1 = scmp.lt.s32.totalorder %s378_s15, 3 }
   0x4   : > { %p162_p2 = pnand %p339_p0, %p161_p1 }
   0x5   : > { %p185_p3 = scmp.lt.s32.totalorder (!%p162_p2), %s335_s16, 1 }
   0x6   : > { %165 = sbr.rel (%p162_p2) target bundleno = 218 (0xda), region = 36 }
   0xb   : > { %v197_v0 = vld [vmem:[%s443_s1 + $0x18] sm:$0xff]  ;;  %v380_v1 = vmov 0.0   ;;  %v196_v2 = vld [vmem:[%s443_s1 + $0x10] sm:$0xff]  ;;  %vm381_vm0 = vmmov 0   ;;  %s448_s16 = smov (!%p185_p3, %s335_s16), 1  ;;  %v195_v3 = vld [vmem:[%s443_s1 + $0x8] sm:$0xff] }
   0xc   : > { %351 = vmatprep.subr.mxu0 %v380_v1  ;;  %359 = vmatprep.mubr.msk.f32.mxu0 %vm381_vm0, %v380_v1  ;;  %s340_s23 = sshll.u32 %s448_s16, 3  ;;  %v194_v4 = vld [vmem:[%s443_s1] sm:$0xff]  ;;  %vm205_vm1 = vcmask 261120  }
   0xd   : > { %352 = vmatpush3.msra.mxu0 %v197_v0  ;;  %s188_s28 = scalar_lea.vmem %s442_s0, %s340_s23  ;;  %v342_v6 = vld [vmem:[%s444_s2] ss:$0 sm:$0xff]  ;;  %s192_s9 = scalar_lea.vmem %s446_s4, %s340_s23 }
   0xe   : > { %353 = vmatprep.subr.mxu0 %v380_v1  ;;  %v193_v5 = vld [vmem:[%s188_s28] sm:$0xff] }
   0xf   : > { %354 = vmatpush3.msra.mxu0 %v196_v2  ;;  %v279_v8 = vld [vmem:[%s445_s3] sm:$0xff] }
  0x10   : > { %355 = vmatprep.subr.mxu0 %v380_v1 }
  0x11   : > { %356 = vmatpush3.msra.mxu0 %v195_v3 }
  0x12   : > { %357 = vmatprep.subr.mxu0 %v380_v1 }
  0x13   : > { %358 = vmatpush3.msra.mxu0 %v194_v4 }
  0x14   : > { %360 = vmatmul.mubr.msk.f32.vlgmr.msra.gmra.mxu0 %vm205_vm1, %v193_v5 }
  0xd4   : > { %v275_v7 = vpop.f32.mrf.mxu0 }
  0xd5   : > { %v276_v9 = vadd.f32 %v342_v6, %v275_v7 }
  0xd6   : > { %v361_v10 = vpop.f32.mrf.mxu0 }
  0xd7   : > { %v280_v11 = vadd.f32 %v279_v8, %v276_v9 }
  0xd9   : > { %281 = vst.msk [vmem:[%s192_s9] sm:$0xff] %vm205_vm1, %v280_v11 }
  0xda PF: > { %s14_s15 = sadd.s32 1, %s378_s15  }
  0xdb   : > { %p11_p4 = scmp.ge.s32.totalorder %s14_s15, 4  }
  0xdd   :  { %13 = sbr.rel (!%p11_p4) target bundleno = 1 (0x1), region = 66 }

// kernel: transformer_forward.7
= control target key start
LH: loop header
LB: loop body
LE: loop exit
PB: predicated region body
PF: predicated region fallthrough
CT: control target
= control target key end

     0   :  { %vm17_vm0 = vcmask 261120   ;;  %v181_v1 = vmov 0.0   ;;  %vm182_vm1 = vmmov 0   ;;  %s231_s0 = inlined_call_operand.vmem [shape: f32[2,8,32], index: 0, kind: input, shape index: {}]   ;;  %s232_s1 = inlined_call_operand.vmem [shape: f32[32,16], index: 1, kind: input, shape index: {}]   ;;  %s233_s2 = inlined_call_operand.vmem [shape: f32[1,16], index: 2, kind: input, shape index: {}]   ;;  %s234_s3 = inlined_call_operand.hbm [shape: f32[2,16], index: 3, kind: output, shape index: {}]  }
   0x1   :  { %v38_v0 = vld [vmem:[%s232_s1 + $0x18] sm:$0xff]  ;;  %145 = vmatprep.subr.mxu0 %v181_v1  ;;  %v37_v2 = vld [vmem:[%s232_s1 + $0x10] sm:$0xff]  ;;  %153 = vmatprep.mubr.msk.f32.mxu0 %vm182_vm1, %v181_v1  ;;  %v15_v3 = vld [vmem:[%s231_s0] sm:$0xff] }
   0x2   :  { %v16_v4 = vld [vmem:[%s231_s0 + $0x8] sm:$0xff]  ;;  %146 = vmatpush3.msra.mxu0 %v38_v0  ;;  %v18_v5 = vsel %vm17_vm0, %v15_v3, 0.0 }
   0x3   :  { %v25_v6 = vsel %vm17_vm0, %v16_v4, 0.0 }
   0x4   :  { %8 = vsyncpa [#allocation3], 0  ;;  %147 = vmatprep.subr.mxu0 %v181_v1  ;;  %v36_v7 = vld [vmem:[%s232_s1 + $0x8] sm:$0xff]  ;;  %v19_v8 = vrot.slane %v18_v5, 4  ;;  %v26_v9 = vrot.slane %v25_v6, 4  ;;  %v35_v10 = vld [vmem:[%s232_s1] sm:$0xff] }
   0x5   :  { %148 = vmatpush3.msra.mxu0 %v37_v2  ;;  %vm48_vm2 = vcmask 1041409   ;;  %v138_v24 = vld [vmem:[%s233_s2] ss:$0 sm:$0xff]  ;;  %s183_s24 = smov [#allocation2]   ;;  %vm122_vm3 = vcmask 123904  }
   0x6   :  { %149 = vmatprep.subr.mxu0 %v181_v1  ;;  %v20_v11 = vadd.f32 %v19_v8, %v18_v5  ;;  %v27_v12 = vadd.f32 %v26_v9, %v25_v6  ;;  %s130_s25 = sshll.u32 %s183_s24, 4  ;;  %s131_s25 = int_to_ptr.vmem [resolvable:$true] %s130_s25 }
   0x7   :  { %150 = vmatpush3.msra.mxu0 %v36_v7  ;;  %s159_s26 = scalar_lea.vmem %s131_s25, 32  ;;  %p164_p1 = scmp.lt.s32.totalorder %s131_s25, %s131_s25 }
   0x8   :  { %151 = vmatprep.subr.mxu0 %v181_v1  ;;  %v21_v13 = vrot.slane %v20_v11, 2  ;;  %v28_v14 = vrot.slane %v27_v12, 2  ;;  %p160_p0 = scmp.ne.s32.totalorder %s131_s25, %s159_s26  ;;  %p165_p2 = scmp.lt.s32.totalorder %s159_s26, %s159_s26 }
   0x9   :  { %152 = vmatpush3.msra.mxu0 %v35_v10 }
   0xa   :  { %v22_v15 = vadd.f32 %v21_v13, %v20_v11  ;;  %v29_v16 = vadd.f32 %v28_v14, %v27_v12  ;;  %p166_p3 = por %p165_p2, %p164_p1 }
   0xc   :  { %v23_v17 = vrot.slane %v22_v15, 1  ;;  %v30_v18 = vrot.slane %v29_v16, 1  ;;  %p167_p4 = pnand %p166_p3, %p160_p0 }
   0xe   :  { %v24_v19 = vadd.f32 %v23_v17, %v22_v15  ;;  %v31_v20 = vadd.f32 %v30_v18, %v29_v16 }
  0x10   :  { %v33_v21 = vmul.f32 0.125, %v24_v19  ;;  %v34_v22 = vmul.f32 0.125, %v31_v20 }
  0x12   :  { %v49_v23 = vsel %vm48_vm2, %v34_v22, %v33_v21 }
  0x13   :  { %154 = vmatmul.mubr.msk.f32.vlgmr.msra.gmra.mxu0 %vm17_vm0, %v49_v23 }
  0xd3   :  { %v118_v25 = vpop.f32.mrf.mxu0 }
  0xd4   :  { %v119_v26 = vadd.f32 %v138_v24, %v118_v25 }
  0xd5   :  { %v155_v27 = vpop.f32.mrf.mxu0 }
  0xd6   :  { %123 = vst.msk [vmem:[#allocation2] sm:$0x3] %vm122_vm3, %v119_v26 }
  0xd7   :  { %170 = shalt.err (!%p167_p4)
}
  0xd8   :  { %133 = dma.vmem_to_hbm [thread:$0]  %s131_s25, 32, %s234_s3, [#allocation3]  }
  0xd9   :  { %179 = dma.done.wait [#allocation3], 32  }
  0xda   :  { %180 = vsyncadd [#allocation3], 4294967264 }
  0xdb   :  { %137 = vsyncpa [#allocation3], 1 }

// kernel: transformer_forward.5
= control target key start
LH: loop header
LB: loop body
LE: loop exit
PB: predicated region body
PF: predicated region fallthrough
CT: control target
= control target key end

     0   :  { %s2093_s25 = smov 0   ;;  %s2311_s0 = inlined_call_operand.vmem [shape: f32[2,8,32], index: 0, kind: input, shape index: {}]   ;;  %s2312_s1 = inlined_call_operand.vmem [shape: f32[32,96], index: 1, kind: input, shape index: {}]   ;;  %s2313_s2 = inlined_call_operand.vmem [shape: f32[1,96], index: 2, kind: input, shape index: {}]   ;;  %s2314_s3 = inlined_call_operand.vmem [shape: f32[32,32], index: 3, kind: input, shape index: {}]   ;;  %s2315_s4 = inlined_call_operand.vmem [shape: f32[1,32], index: 4, kind: input, shape index: {}]   ;;  %s2316_s5 = inlined_call_operand.vmem [shape: f32[1,32], index: 5, kind: input, shape index: {}]   ;;  %s2317_s6 = inlined_call_operand.vmem [shape: f32[1,32], index: 6, kind: input, shape index: {}]   ;;  %s2318_s7 = inlined_call_operand.vmem [shape: f32[32,64], index: 7, kind: input, shape index: {}]   ;;  %s2319_s8 = inlined_call_operand.vmem [shape: f32[1,64], index: 8, kind: input, shape index: {}]   ;;  %s2320_s9 = inlined_call_operand.vmem [shape: f32[64,32], index: 9, kind: input, shape index: {}]   ;;  %s2321_s10 = inlined_call_operand.vmem [shape: f32[1,32], index: 10, kind: input, shape index: {}]   ;;  %s2322_s11 = inlined_call_operand.vmem [shape: f32[1,32], index: 11, kind: input, shape index: {}]   ;;  %s2323_s12 = inlined_call_operand.vmem [shape: f32[1,32], index: 12, kind: input, shape index: {}]   ;;  %s2324_s13 = inlined_call_operand.vmem [shape: f32[2,8,32], index: 13, kind: output, shape index: {}]  }
   0x1 LB: > { %s1781_s26 = sadd.s32 4294967295, %s2008_s25   ;;  %p1785_p0 = scmp.ge.s32.totalorder %s2008_s25, 1  ;;  %s2008_s25 = sphi %s2093_s25, %s23_s25  }
   0x2   : > { %p386_p1 = scmp.lt.s32.totalorder %s2008_s25, 3 }
   0x4   : > { %p387_p2 = pnand %p1785_p0, %p386_p1 }
   0x5   : > { %p428_p3 = scmp.lt.s32.totalorder (!%p387_p2), %s1781_s26, 1  ;;  %s2012_s24 = smov (!%p387_p2), 120  }
   0x6   : > { %390 = sbr.rel (%p387_p2) target bundleno = 3462 (0xd86), region = 72  ;;  %s2013_s27 = smov (!%p387_p2), 96  }
   0x7   : > { %s2014_s28 = smov (!%p387_p2), 88   ;;  %s2015_s29 = smov (!%p387_p2), 56  }
   0x8   : > { %s2016_s30 = smov (!%p387_p2), 64   ;;  %s2017_s14 = smov (!%p387_p2), 80  }
   0x9   : > { %s2018_s15 = smov (!%p387_p2), 112   ;;  %s2020_s22 = smov (!%p387_p2), 104  }
   0xa   : > { %s2021_s23 = smov (!%p387_p2), 48  }
   0xb   : > { %v440_v0 = vld [vmem:[%s2312_s1 + $0x18] sm:$0xff]  ;;  %v2010_v1 = vmov 0.0   ;;  %v439_v2 = vld [vmem:[%s2312_s1 + $0x10] sm:$0xff]  ;;  %vm2011_vm0 = vmmov 0   ;;  %s2326_s26 = smov (!%p428_p3, %s1781_s26), 1  ;;  %v438_v3 = vld [vmem:[%s2312_s1 + $0x8] sm:$0xff] }
   0xc   : > { %1860 = vmatprep.subr.mxu0 %v2010_v1  ;;  %1868 = vmatprep.mubr.msk.f32.mxu0 %vm2011_vm0, %v2010_v1  ;;  %s1786_s16 = sshll.u32 %s2326_s26, 3  ;;  %v437_v4 = vld [vmem:[%s2312_s1] sm:$0xff]  ;;  %vm448_vm1 = vcmask 261120   ;;  %vm529_vm2 = vcmask 64512   ;;  %v523_v40 = vld [vmem:[%s2314_s3 + $0x8] sm:$0xff]  ;;  %vm1623_vm3 = vcmask 523264  }
   0xd   : > { %1861 = vmatpush3.msra.mxu0 %v440_v0  ;;  %1876 = vmatprep.subr.mxu1 %v2010_v1  ;;  %s431_s21 = scalar_lea.vmem %s2311_s0, %s1786_s16  ;;  %v1788_v6 = vld [vmem:[%s2313_s2] ss:$0 sm:$0xff] }
   0xe   : > { %1862 = vmatprep.subr.mxu0 %v2010_v1  ;;  %1878 = vmatprep.mubr.msk.f32.mxu1 %vm2011_vm0, %v2010_v1  ;;  %v2129_v5 = vld [vmem:[%s431_s21] sm:$0xff]  ;;  %s2019_s21 = smov 72  }
   0xf   : > { %1863 = vmatpush3.msra.mxu0 %v439_v2  ;;  %v522_v39 = vld [vmem:[%s2314_s3] sm:$0xff] }
  0x10   : > { %1864 = vmatprep.subr.mxu0 %v2010_v1 }
  0x11   : > { %1865 = vmatpush3.msra.mxu0 %v438_v3 }
  0x12   : > { %1866 = vmatprep.subr.mxu0 %v2010_v1 }
  0x13   : > { %1867 = vmatpush3.msra.mxu0 %v437_v4  ;;  %v524_v4 = vld [vmem:[%s2314_s3 + $0x10] sm:$0xff] }
  0x14   : > { %1869 = vmatmul.mubr.msk.f32.vlgmr.msra.gmra.mxu0 %vm448_vm1, %v2129_v5  ;;  %1871 = vmatprep.subr.mxu0 %v2010_v1 }
  0x15   : > { %1873 = vmatprep.mubr.msk.f32.mxu0 %vm2011_vm0, %v2010_v1 }
  0xd4   : > { %v518_v7 = vpop.f32.mrf.mxu0 }
  0xd5   : > { %v2140_v8 = vadd.f32 %v1788_v6, %v518_v7 }
  0xd6   : > { %v1870_v9 = vpop.f32.mrf.mxu0 }
  0xd7   : > { %692 = vrot.lane.b32.xlu1 %v2140_v8, %s2012_s24  ;;  %527 = vrot.lane.b32.xlu0 %v2140_v8, %s2013_s27 }
  0xdb   : > { %694 = vrot.lane.b32.xlu0 %v2140_v8, %s2014_s28  ;;  %s2022_s28 = smov 40  }
 0x149   : > { %v528_v10 = vpop.permute.xlu0 %527  ;;  %v693_v12 = vpop.permute.xlu1 %692 }
 0x14a   : > { %1872 = vmatpush3.xpose.msk.msra.mxu0 %vm529_vm2, %v528_v10 }
 0x14b   : > { %1881 = vmatprep.subr.mxu0 %v2010_v1 }
 0x14d   : > { %1874 = vmatmul.mubr.msk.f32.vlgmr.msra.gmra.mxu0 %vm529_vm2, %v2140_v8  ;;  %v695_v11 = vpop.permute.xlu0 %694 }
 0x14e   : > { %1882 = vmatpush3.xpose.msk.msra.mxu0 %vm529_vm2, %v695_v11  ;;  %1883 = vmatprep.mubr.msk.f32.mxu0 %vm2011_vm0, %v2010_v1 }
 0x14f   : > { %1891 = vmatprep.subr.mxu0 %v2010_v1 }
 0x151   : > { %1884 = vmatmul.mubr.msk.f32.vlgmr.msra.gmra.mxu0 %vm529_vm2, %v693_v12 }
 0x152   : > { %1893 = vmatprep.mubr.msk.f32.mxu0 %vm2011_vm0, %v2010_v1  ;;  %1892 = vmatpush3.msra.mxu0 %v523_v40  ;;  %v1525_v40 = vld [vmem:[%s2318_s7 + $0x10] sm:$0xff] }
 0x153   : > { %1901 = vmatprep.subr.mxu0 %v2010_v1 }
 0x20d   : > { %v600_v13 = vpop.f32.mrf.mxu0 }
 0x20e   : > { %v604_v14 = vmul.f32 0.35355338, %v600_v13 }
 0x20f   : > { %v1875_v15 = vpop.f32.mrf.mxu0 }
 0x210   : > { %v605_v16 = vsel %vm529_vm2, %v604_v14, -inf }
 0x211   : > { %606 = vmax.xlane.f32.xlu1 %v605_v16  ;;  %v766_v17 = vpop.f32.mrf.mxu0 }
 0x212   : > { %v770_v18 = vmul.f32 0.35355338, %v766_v17 }
 0x213   : > { %v1885_v19 = vpop.f32.mrf.mxu0 }
 0x214   : > { %v771_v20 = vsel %vm529_vm2, %v770_v18, -inf  ;;  %v525_v19 = vld [vmem:[%s2314_s3 + $0x18] sm:$0xff] }
 0x215   : > { %772 = vmax.xlane.f32.xlu0 %v771_v20 }
 0x29a   : > { %v607_v21 = vpop.xlane.xlu1 %606 }
 0x29b   : > { %v608_v22 = vsub.f32 %v604_v14, %v607_v21 }
 0x29d   : > { %v609_v23 = vmul.f32 1.442695, %v608_v22 }
 0x29e   : > { %v773_v24 = vpop.xlane.xlu0 %772 }
 0x29f   : > { %1982 = vpow2.f32 %v609_v23  ;;  %v774_v25 = vsub.f32 %v770_v18, %v773_v24 }
 0x2a1   : > { %v775_v26 = vmul.f32 1.442695, %v774_v25 }
 0x2a3   : > { %1984 = vpow2.f32 %v775_v26 }
 0x2ac   : > { %v1983_v27 = vpop.eup %1982 }
 0x2ad   : > { %v611_v28 = vsel %vm529_vm2, %v1983_v27, 0.0 }
 0x2ae   : > { %612 = vadd.xlane.f32.xlu0 %v611_v28  ;;  %v1806_v28 = vld [vmem:[%s2315_s4] ss:$0 sm:$0xff] }
 0x2b0   : > { %v1985_v29 = vpop.eup %1984 }
 0x2b1   : > { %v777_v30 = vsel %vm529_vm2, %v1985_v29, 0.0 }
 0x2b2   : > { %778 = vadd.xlane.f32.xlu1 %v777_v30 }
 0x2c3   : > { %782 = vrot.lane.b32.xlu1 %v2140_v8, %s2015_s29  ;;  %s435_s29 = scalar_lea.vmem %s2324_s13, %s1786_s16 }
 0x2c4   : > { %616 = vrot.lane.b32.xlu0 %v2140_v8, %s2016_s30 }
 0x2c7   : > { %1006 = vrot.lane.b32.xlu1 %v2140_v8, %s2017_s14 }
 0x2c8   : > { %1004 = vrot.lane.b32.xlu0 %v2140_v8, %s2018_s15 }
 0x337   : > { %v613_v31 = vpop.xlane.xlu0 %612 }
 0x338   : > { %1986 = vrcp.f32 %v613_v31 }
 0x33b   : > { %v779_v32 = vpop.xlane.xlu1 %778  ;;  %v617_v33 = vpop.permute.xlu0 %616 }
 0x33c   : > { %1988 = vrcp.f32 %v779_v32  ;;  %1877 = vmatpush3.msra.mxu1 %v617_v33 }
 0x33d   : > { %1886 = vmatprep.subr.mxu1 %v2010_v1 }
 0x33f   : > { %v783_v36 = vpop.permute.xlu1 %782  ;;  %v1005_v46 = vpop.permute.xlu0 %1004 }
 0x343   : > { %v1007_v44 = vpop.permute.xlu1 %1006 }
 0x345   : > { %v1987_v34 = vpop.eup %1986 }
 0x346   : > { %v615_v35 = vmul.f32 %v1987_v34, %v1983_v27 }
 0x348   : > { %1879 = vmatmul.mubr.msk.f32.vlgmr.msra.gmra.mxu1 %vm529_vm2, %v615_v35 }
 0x349   : > { %v1989_v37 = vpop.eup %1988  ;;  %1887 = vmatpush3.msra.mxu1 %v783_v36  ;;  %1888 = vmatprep.mubr.msk.f32.mxu1 %vm2011_vm0, %v2010_v1 }
 0x34a   : > { %v781_v38 = vmul.f32 %v1989_v37, %v1985_v29  ;;  %1896 = vmatprep.subr.mxu1 %v2010_v1 }
 0x34c   : > { %1889 = vmatmul.mubr.msk.f32.vlgmr.msra.gmra.mxu1 %vm529_vm2, %v781_v38 }
 0x34d   : > { %1898 = vmatprep.mubr.msk.f32.mxu1 %vm2011_vm0, %v2010_v1  ;;  %1897 = vmatpush3.msra.mxu1 %v522_v39  ;;  %v1526_v39 = vld [vmem:[%s2318_s7 + $0x18] sm:$0xff] }
 0x34e   : > { %1906 = vmatprep.subr.mxu1 %v2010_v1 }
 0x408   : > { %v688_v41 = vpop.f32.mrf.mxu1 }
 0x409   : > { %1899 = vmatmul.mubr.msk.f32.vlgmr.msra.gmra.mxu1 %vm529_vm2, %v688_v41  ;;  %v1523_v41 = vld [vmem:[%s2318_s7] sm:$0xff] }
 0x40a   : > { %v1880_v42 = vpop.f32.mrf.mxu1  ;;  %1908 = vmatprep.mubr.msk.f32.mxu1 %vm2011_vm0, %v2010_v1 }
 0x40b   : > { %v1615_v42 = vld [vmem:[%s2320_s9 + $0x38] sm:$0xff] }
 0x40c   : > { %v854_v43 = vpop.f32.mrf.mxu1 }
 0x40d   : > { %1894 = vmatmul.mubr.msk.f32.vlgmr.msra.gmra.mxu0 %vm529_vm2, %v854_v43  ;;  %v1614_v43 = vld [vmem:[%s2320_s9 + $0x30] sm:$0xff] }
 0x40e   : > { %1902 = vmatpush3.xpose.msk.msra.mxu0 %vm529_vm2, %v1007_v44  ;;  %v1890_v45 = vpop.f32.mrf.mxu1  ;;  %1903 = vmatprep.mubr.msk.f32.mxu0 %vm2011_vm0, %v2010_v1  ;;  %v1613_v44 = vld [vmem:[%s2320_s9 + $0x28] sm:$0xff] }
 0x40f   : > { %1911 = vmatprep.subr.mxu0 %v2010_v1  ;;  %v1612_v45 = vld [vmem:[%s2320_s9 + $0x20] sm:$0xff] }
 0x411   : > { %1904 = vmatmul.mubr.msk.f32.vlgmr.msra.gmra.mxu0 %vm529_vm2, %v1005_v46  ;;  %v1611_v46 = vld [vmem:[%s2320_s9 + $0x18] sm:$0xff] }
 0x412   : > { %1913 = vmatprep.mubr.msk.f32.mxu0 %vm2011_vm0, %v2010_v1  ;;  %1912 = vmatpush3.msra.mxu0 %v524_v4 }
 0x413   : > { %1921 = vmatprep.subr.mxu0 %v2010_v1 }
 0x4c9   : > { %v1000_v47 = vpop.f32.mrf.mxu1 }
 0x4cb   : > { %v1900_v48 = vpop.f32.mrf.mxu1 }
 0x4cd   : > { %v927_v49 = vpop.f32.mrf.mxu0 }
 0x4ce   : > { %v2191_v50 = vadd.f32 %v1000_v47, %v927_v49 }
 0x4cf   : > { %v1895_v51 = vpop.f32.mrf.mxu0 }
 0x4d0   : > { %v1807_v51 = vld [vmem:[%s2316_s5] ss:$0 sm:$0xff] }
 0x4d1   : > { %v1078_v52 = vpop.f32.mrf.mxu0 }
 0x4d2   : > { %v1082_v53 = vmul.f32 0.35355338, %v1078_v52 }
 0x4d3   : > { %v1905_v54 = vpop.f32.mrf.mxu0 }
 0x4d4   : > { %v1083_v55 = vsel %vm529_vm2, %v1082_v53, -inf }
 0x4d5   : > { %1084 = vmax.xlane.f32.xlu1 %v1083_v55 }
 0x4e6   : > { %1246 = vrot.lane.b32.xlu1 %v2140_v8, %s2019_s21 }
 0x4ea   : > { %1244 = vrot.lane.b32.xlu1 %v2140_v8, %s2020_s22 }
 0x55e   : > { %v1085_v56 = vpop.xlane.xlu1 %1084 }
 0x55f   : > { %v1086_v57 = vsub.f32 %v1082_v53, %v1085_v56  ;;  %v1808_v53 = vld [vmem:[%s2317_s6] ss:$0 sm:$0xff]  ;;  %v1610_v56 = vld [vmem:[%s2320_s9 + $0x10] sm:$0xff] }
 0x561   : > { %v1087_v58 = vmul.f32 1.442695, %v1086_v57  ;;  %v1609_v57 = vld [vmem:[%s2320_s9 + $0x8] sm:$0xff] }
 0x562   : > { %v1247_v0 = vpop.permute.xlu1 %1246 }
 0x563   : > { %1990 = vpow2.f32 %v1087_v58  ;;  %v1608_v58 = vld [vmem:[%s2320_s9] sm:$0xff] }
 0x566   : > { %v1245_v3 = vpop.permute.xlu1 %1244 }
 0x570   : > { %v1991_v59 = vpop.eup %1990 }
 0x571   : > { %v1089_v60 = vsel %vm529_vm2, %v1991_v59, 0.0 }
 0x572   : > { %1090 = vadd.xlane.f32.xlu0 %v1089_v60 }
 0x588   : > { %1094 = vrot.lane.b32.xlu0 %v2140_v8, %s2021_s23 }
 0x5fb   : > { %v1091_v61 = vpop.xlane.xlu0 %1090 }
 0x5fc   : > { %1992 = vrcp.f32 %v1091_v61 }
 0x5ff   : > { %v1095_v62 = vpop.permute.xlu0 %1094 }
 0x600   : > { %1907 = vmatpush3.msra.mxu1 %v1095_v62 }
 0x601   : > { %1916 = vmatprep.subr.mxu1 %v2010_v1 }
 0x609   : > { %v1993_v63 = vpop.eup %1992 }
 0x60a   : > { %v1093_v2 = vmul.f32 %v1993_v63, %v1991_v59  ;;  %v1809_v59 = vld [vmem:[%s2319_s8] ss:$0 sm:$0xff] }
 0x60c   : > { %1909 = vmatmul.mubr.msk.f32.vlgmr.msra.gmra.mxu1 %vm529_vm2, %v1093_v2 }
 0x60d   : > { %1917 = vmatpush3.xpose.msk.msra.mxu1 %vm529_vm2, %v1247_v0  ;;  %1918 = vmatprep.mubr.msk.f32.mxu1 %vm2011_vm0, %v2010_v1  ;;  %v1811_v0 = vld [vmem:[%s2321_s10] ss:$0 sm:$0xff] }
 0x60e   : > { %1926 = vmatprep.subr.mxu1 %v2010_v1 }
 0x610   : > { %1919 = vmatmul.mubr.msk.f32.vlgmr.msra.gmra.mxu1 %vm529_vm2, %v1245_v3 }
 0x611   : > { %1928 = vmatprep.mubr.msk.f32.mxu1 %vm2011_vm0, %v2010_v1  ;;  %1927 = vmatpush3.msra.mxu1 %v525_v19  ;;  %v1814_v19 = vld [vmem:[%s2323_s12] ss:$0 sm:$0xff] }
 0x612   : > { %1942 = vmatprep.subr.mxu1 %v2010_v1 }
 0x6cc   : > { %v1166_v6 = vpop.f32.mrf.mxu1 }
 0x6cd   : > { %1914 = vmatmul.mubr.msk.f32.vlgmr.msra.gmra.mxu0 %vm529_vm2, %v1166_v6 }
 0x6ce   : > { %v1910_v7 = vpop.f32.mrf.mxu1  ;;  %1923 = vmatprep.mubr.msk.f32.mxu0 %vm2011_vm0, %v2010_v1 }
 0x6d0   : > { %v1318_v9 = vpop.f32.mrf.mxu1 }
 0x6d1   : > { %v1322_v10 = vmul.f32 0.35355338, %v1318_v9 }
 0x6d2   : > { %v1920_v11 = vpop.f32.mrf.mxu1 }
 0x6d3   : > { %v1323_v12 = vsel %vm529_vm2, %v1322_v10, -inf }
 0x6d4   : > { %1324 = vmax.xlane.f32.xlu0 %v1323_v12 }
 0x6ea   : > { %1334 = vrot.lane.b32.xlu0 %v2140_v8, %s2022_s28 }
 0x75d   : > { %v1325_v13 = vpop.xlane.xlu0 %1324 }
 0x75e   : > { %v1326_v14 = vsub.f32 %v1322_v10, %v1325_v13 }
 0x760   : > { %v1327_v15 = vmul.f32 1.442695, %v1326_v14 }
 0x761   : > { %v1335_v16 = vpop.permute.xlu0 %1334 }
 0x762   : > { %1994 = vpow2.f32 %v1327_v15  ;;  %1922 = vmatpush3.msra.mxu0 %v1335_v16 }
 0x763   : > { %1931 = vmatprep.subr.mxu0 %v2010_v1 }
 0x76f   : > { %v1995_v17 = vpop.eup %1994 }
 0x770   : > { %v1329_v18 = vsel %vm529_vm2, %v1995_v17, 0.0 }
 0x771   : > { %1330 = vadd.xlane.f32.xlu1 %v1329_v18 }
 0x78d   : > { %v1239_v20 = vpop.f32.mrf.mxu0 }
 0x78e   : > { %v1243_v8 = vadd.f32 %v1239_v20, %v2191_v50 }
 0x78f   : > { %v1915_v21 = vpop.f32.mrf.mxu0 }
 0x7fa   : > { %v1331_v22 = vpop.xlane.xlu1 %1330 }
 0x7fb   : > { %1996 = vrcp.f32 %v1331_v22 }
 0x808   : > { %v1997_v23 = vpop.eup %1996 }
 0x809   : > { %v1333_v24 = vmul.f32 %v1997_v23, %v1995_v17  ;;  %v1813_v17 = vld [vmem:[%s2322_s11] ss:$0 sm:$0xff] }
 0x80b   : > { %1924 = vmatmul.mubr.msk.f32.vlgmr.msra.gmra.mxu0 %vm529_vm2, %v1333_v24 }
 0x80c   : > { %1939 = vmatprep.mubr.msk.f32.mxu0 %vm2011_vm0, %v2010_v1  ;;  %1932 = vmatpush3.msra.mxu0 %v1526_v39 }
 0x80d   : > { %1933 = vmatprep.subr.mxu0 %v2010_v1 }
 0x80e   : > { %1934 = vmatpush3.msra.mxu0 %v1525_v40 }
 0x80f   : > { %1935 = vmatprep.subr.mxu0 %v2010_v1 }
 0x8cb   : > { %v1406_v25 = vpop.f32.mrf.mxu0 }
 0x8cc   : > { %1929 = vmatmul.mubr.msk.f32.vlgmr.msra.gmra.mxu1 %vm529_vm2, %v1406_v25 }
 0x8cd   : > { %v1925_v26 = vpop.f32.mrf.mxu0  ;;  %1958 = vmatprep.mubr.msk.f32.mxu1 %vm2011_vm0, %v2010_v1  ;;  %1943 = vmatpush3.msra.mxu1 %v1615_v42 }
 0x8ce   : > { %1944 = vmatprep.subr.mxu1 %v2010_v1 }
 0x8cf   : > { %1945 = vmatpush3.msra.mxu1 %v1614_v43 }
 0x8d0   : > { %1946 = vmatprep.subr.mxu1 %v2010_v1 }
 0x8d1   : > { %1947 = vmatpush3.msra.mxu1 %v1613_v44 }
 0x8d2   : > { %1948 = vmatprep.subr.mxu1 %v2010_v1 }
 0x8d3   : > { %1949 = vmatpush3.msra.mxu1 %v1612_v45 }
 0x8d4   : > { %1950 = vmatprep.subr.mxu1 %v2010_v1 }
 0x8d5   : > { %1951 = vmatpush3.msra.mxu1 %v1611_v46 }
 0x8d6   : > { %1952 = vmatprep.subr.mxu1 %v2010_v1 }
 0x8d7   : > { %1953 = vmatpush3.msra.mxu1 %v1610_v56 }
 0x8d8   : > { %1954 = vmatprep.subr.mxu1 %v2010_v1 }
 0x8d9   : > { %1955 = vmatpush3.msra.mxu1 %v1609_v57 }
 0x8da   : > { %1956 = vmatprep.subr.mxu1 %v2010_v1 }
 0x8db   : > { %1957 = vmatpush3.msra.mxu1 %v1608_v58 }
 0x98c   : > { %v1479_v27 = vpop.f32.mrf.mxu1 }
 0x98d   : > { %v1483_v29 = vadd.f32 %v1479_v27, %v1243_v8 }
 0x98e   : > { %v1930_v30 = vpop.f32.mrf.mxu1 }
 0x98f   : > { %v1491_v31 = vadd.f32 %v1806_v28, %v1483_v29 }
 0x991   : > { %v1492_v32 = vadd.f32 %v1491_v31, %v2129_v5  ;;  %v1524_v5 = vld [vmem:[%s2318_s7 + $0x8] sm:$0xff] }
 0x992   : > { %1936 = vmatpush3.msra.mxu0 %v1524_v5 }
 0x993   : > { %v1493_v33 = vsel %vm448_vm1, %v1492_v32, 0.0  ;;  %1937 = vmatprep.subr.mxu0 %v2010_v1 }
 0x994   : > { %1494 = vadd.xlane.f32.xlu1 %v1493_v33  ;;  %1938 = vmatpush3.msra.mxu0 %v1523_v41 }
 0xa1d   : > { %v1495_v34 = vpop.xlane.xlu1 %1494 }
 0xa1e   : > { %v1497_v35 = vmul.f32 0.03125, %v1495_v34 }
 0xa20   : > { %v1498_v36 = vsub.f32 %v1492_v32, %v1497_v35 }
 0xa22   : > { %v1499_v37 = vmul.f32 %v1498_v36, %v1498_v36 }
 0xa24   : > { %v1500_v38 = vsel %vm448_vm1, %v1499_v37, 0.0 }
 0xa25   : > { %1501 = vadd.xlane.f32.xlu1 %v1500_v38 }
 0xaae   : > { %v1502_v47 = vpop.xlane.xlu1 %1501 }
 0xaaf   : > { %v1503_v48 = vmul.f32 0.03125, %v1502_v47 }
 0xab1   : > { %v1504_v49 = vadd.f32 1e-05, %v1503_v48 }
 0xab3   : > { %1998 = vrsqrt.f32 %v1504_v49 }
 0xac0   : > { %v1999_v50 = vpop.eup %1998 }
 0xac1   : > { %v1506_v52 = vmul.f32 %v1999_v50, %v1498_v36 }
 0xac3   : > { %v1514_v54 = vmul.f32 %v1807_v51, %v1506_v52 }
 0xac5   : > { %v1522_v55 = vadd.f32 %v1808_v53, %v1514_v54 }
 0xac7   : > { %1940 = vmatmul.mubr.msk.f32.vlgmr.msra.gmra.mxu0 %vm448_vm1, %v1522_v55 }
 0xb87   : > { %v1603_v60 = vpop.f32.mrf.mxu0 }
 0xb88   : > { %v1604_v61 = vadd.f32 %v1809_v59, %v1603_v60 }
 0xb89   : > { %v1941_v62 = vpop.f32.mrf.mxu0 }
 0xb8a   : > { %v1607_v63 = vmax.f32 %v1604_v61, 0.0 }
 0xb8c   : > { %1959 = vmatmul.mubr.msk.f32.vlgmr.msra.gmra.mxu1 %vm1623_vm3, %v1607_v63 }
 0xc4c   : > { %v1693_v2 = vpop.f32.mrf.mxu1 }
 0xc4d   : > { %v1694_v3 = vadd.f32 %v1811_v0, %v1693_v2 }
 0xc4e   : > { %v1960_v4 = vpop.f32.mrf.mxu1 }
 0xc4f   : > { %v1697_v6 = vadd.f32 %v1694_v3, %v1522_v55 }
 0xc51   : > { %v1698_v1 = vsel %vm448_vm1, %v1697_v6, 0.0 }
 0xc52   : > { %1699 = vadd.xlane.f32.xlu1 %v1698_v1 }
 0xcdb   : > { %v1700_v7 = vpop.xlane.xlu1 %1699 }
 0xcdc   : > { %v1701_v9 = vmul.f32 0.03125, %v1700_v7 }
 0xcde   : > { %v1702_v10 = vsub.f32 %v1697_v6, %v1701_v9 }
 0xce0   : > { %v1703_v11 = vmul.f32 %v1702_v10, %v1702_v10 }
 0xce2   : > { %v1704_v12 = vsel %vm448_vm1, %v1703_v11, 0.0 }
 0xce3   : > { %1705 = vadd.xlane.f32.xlu1 %v1704_v12 }
 0xd6c   : > { %v1706_v13 = vpop.xlane.xlu1 %1705 }
 0xd6d   : > { %v1707_v14 = vmul.f32 0.03125, %v1706_v13 }
 0xd6f   : > { %v1708_v15 = vadd.f32 1e-05, %v1707_v14 }
 0xd71   : > { %2000 = vrsqrt.f32 %v1708_v15 }
 0xd7e   : > { %v2001_v16 = vpop.eup %2000 }
 0xd7f   : > { %v1710_v18 = vmul.f32 %v2001_v16, %v1702_v10 }
 0xd81   : > { %v1718_v20 = vmul.f32 %v1813_v17, %v1710_v18 }
 0xd83   : > { %v1726_v8 = vadd.f32 %v1814_v19, %v1718_v20 }
 0xd85   : > { %1727 = vst.msk [vmem:[%s435_s29] sm:$0xff] %vm448_vm1, %v1726_v8 }
 0xd86 PF: > { %s23_s25 = sadd.s32 1, %s2008_s25  }
 0xd87   : > { %p20_p4 = scmp.ge.s32.totalorder %s23_s25, 4  }
 0xd89   :  { %22 = sbr.rel (!%p20_p4) target bundleno = 1 (0x1), region = 102 }

</bundles_post_ra>
